<compile_context>
chip_gen: v6e
topology: v6e:2x2x1
jax: 0.10.0
libtpu: 0.0.40
codegen_flags: <defaults>
</compile_context>

<pallas_src>
import functools

import jax
import jax.numpy as jnp
from jax import lax
from jax.experimental import pallas as pl
from jax.experimental.pallas import tpu as pltpu

SMOOTHING = 0.1
CONFIDENCE = 1.0 - SMOOTHING


def _ls_ce_kernel(x_ref, t_ref, psum_ref, *, n_total, block_n, confidence,
                  smoothing):
    """One row-tile: partial sum of per-row label-smoothed CE losses."""
    i = pl.program_id(0)

    x = x_ref[...].astype(jnp.float32)                        # (TN, C)
    t = t_ref[...]                                            # (TN, 1) int32

    # Numerically stable pieces of log_softmax, kept as (TN, 1) columns.
    m = jnp.max(x, axis=-1, keepdims=True)                    # (TN, 1)
    shifted = x - m                                           # (TN, C)
    lse = jnp.log(jnp.sum(jnp.exp(shifted), axis=-1, keepdims=True))  # (TN, 1)

    # Fused loss (no logprobs / one-hot materialization):
    #   nll    = lse - shifted[target]
    #   smooth = lse - mean(shifted)
    #   loss   = conf*nll + sm*smooth = lse - conf*shifted_t - sm*mean(shifted)
    col = lax.broadcasted_iota(jnp.int32, shifted.shape, 1)   # (TN, C)
    shifted_t = jnp.sum(jnp.where(col == t, shifted, 0.0),
                        axis=-1, keepdims=True)               # (TN, 1)
    shifted_mean = jnp.mean(shifted, axis=-1, keepdims=True)  # (TN, 1)

    loss = lse - confidence * shifted_t - smoothing * shifted_mean  # (TN, 1)

    # Mask rows past the true batch size (partial last tile).
    row = i * block_n + lax.broadcasted_iota(jnp.int32, loss.shape, 0)
    loss = jnp.where(row < n_total, loss, 0.0)

    psum_ref[...] = jnp.sum(loss, axis=(0, 1), keepdims=True)  # (1, 1)


def _round_up(a, b):
    return ((a + b - 1) // b) * b


def label_smoothing_cross_entropy(x, target, smoothing=SMOOTHING,
                                  max_tile_bytes=2 * 1024 * 1024):
    """x: (N, C) float logits, target: (N,) int labels -> scalar loss."""
    N, C = x.shape
    confidence = 1.0 - smoothing

    # Row-tile size: multiple of 8, sized to ~max_tile_bytes of logits so the
    # double-buffered pipeline stays well inside scoped VMEM on v5e/v6e/v7x.
    itemsize = jnp.dtype(x.dtype).itemsize
    rows_cap = max(8, ((max_tile_bytes // max(1, C * itemsize)) // 8) * 8)
    block_n = int(max(8, min(rows_cap, _round_up(N, 8), 1024)))
    grid_n = pl.cdiv(N, block_n)

    # Keep x in its input dtype (bf16 logits stream at half the HBM bytes);
    # the cast to f32 happens per-tile inside the kernel.
    t2d = target.astype(jnp.int32).reshape(N, 1)

    kernel = functools.partial(
        _ls_ce_kernel,
        n_total=N,
        block_n=block_n,
        confidence=confidence,
        smoothing=smoothing,
    )

    partial_sums = pl.pallas_call(
        kernel,
        out_shape=jax.ShapeDtypeStruct((grid_n, 1), jnp.float32),
        grid_spec=pltpu.PrefetchScalarGridSpec(
            num_scalar_prefetch=0,
            grid=(grid_n,),
            in_specs=[
                pl.BlockSpec((block_n, C), lambda i: (i, 0)),
                pl.BlockSpec((block_n, 1), lambda i: (i, 0)),
            ],
            out_specs=pl.BlockSpec((1, 1), lambda i: (i, 0)),
        ),
        compiler_params=pltpu.CompilerParams(
            dimension_semantics=("parallel",),
        ),
    )(x, t2d)

    # Tiny final reduction: sum of partial sums, divide by the true N once.
    return jnp.sum(partial_sums) / N


def _reference(x, target, smoothing=SMOOTHING):
    confidence = 1.0 - smoothing
    logprobs = jax.nn.log_softmax(x.astype(jnp.float32), axis=-1)
    nll = -jnp.take_along_axis(
        logprobs, target[:, None].astype(jnp.int32), axis=-1)[:, 0]
    smooth = -jnp.mean(logprobs, axis=-1)
    loss = confidence * nll + smoothing * smooth
    return jnp.mean(loss)


if __name__ == "__main__":
    key = jax.random.PRNGKey(0)
    kx, kt = jax.random.split(key)

    N, C = 8, 32                      # batch=8, num_classes=32
    x = jax.random.normal(kx, (N, C), dtype=jnp.float32)
    target = jax.random.randint(kt, (N,), 0, C, dtype=jnp.int32)

    loss = label_smoothing_cross_entropy(x, target)
    jax.block_until_ready(loss)

    ref = _reference(x, target)
    assert jnp.allclose(loss, ref, atol=1e-5, rtol=1e-5), (loss, ref)

    print("KERNEL_OK")
</pallas_src>

<mosaic_0001>
module attributes {stable_mosaic.version = 11 : i64} {
  func.func @_ls_ce_kernel(%arg0: i32, %arg1: memref<8x32xf32, #tpu.memory_space<vmem>>, %arg2: memref<8x1xi32, #tpu.memory_space<vmem>>, %arg3: memref<1x1xf32, #tpu.memory_space<vmem>>) attributes {dimension_semantics = [#tpu.dimension_semantics<parallel>], iteration_bounds = array<i64: 1>, scalar_prefetch = 0 : i64, scratch_operands = 0 : i64, tpu.core_type = #tpu.core_type<tc>, window_params = [{transform_indices = @transform_0, window_bounds = array<i64: 8, 32>}, {transform_indices = @transform_1, window_bounds = array<i64: 8, 1>}, {transform_indices = @transform_2, window_bounds = array<i64: 1, 1>}]} {
    %c0 = arith.constant 0 : index
    %c0_0 = arith.constant 0 : index
    %0 = vector.load %arg1[%c0, %c0_0] : memref<8x32xf32, #tpu.memory_space<vmem>>, vector<8x32xf32>
    %c0_1 = arith.constant 0 : index
    %c0_2 = arith.constant 0 : index
    %1 = vector.load %arg2[%c0_1, %c0_2] : memref<8x1xi32, #tpu.memory_space<vmem>>, vector<8x1xi32>
    %cst = arith.constant dense<0xFF800000> : vector<8xf32>
    %2 = vector.multi_reduction <maximumf>, %0, %cst [1] : vector<8x32xf32> to vector<8xf32>
    %3 = vector.shape_cast %2 : vector<8xf32> to vector<8x1xf32>
    %4 = vector.broadcast %3 : vector<8x1xf32> to vector<8x32xf32>
    %5 = arith.subf %0, %4 : vector<8x32xf32>
    %6 = math.exp %5 : vector<8x32xf32>
    %cst_3 = arith.constant dense<0.000000e+00> : vector<8xf32>
    %7 = vector.multi_reduction <add>, %6, %cst_3 [1] : vector<8x32xf32> to vector<8xf32>
    %8 = vector.shape_cast %7 : vector<8xf32> to vector<8x1xf32>
    %9 = math.log %8 : vector<8x1xf32>
    %10 = tpu.iota {dimensions = array<i32: 1>} : vector<8x32xi32>
    %11 = vector.broadcast %1 : vector<8x1xi32> to vector<8x32xi32>
    %12 = arith.cmpi eq, %10, %11 : vector<8x32xi32>
    %cst_4 = arith.constant 0.000000e+00 : f32
    %13 = vector.broadcast %cst_4 : f32 to vector<8x32xf32>
    %14 = arith.select %12, %5, %13 : vector<8x32xi1>, vector<8x32xf32>
    %cst_5 = arith.constant dense<0.000000e+00> : vector<8xf32>
    %15 = vector.multi_reduction <add>, %14, %cst_5 [1] : vector<8x32xf32> to vector<8xf32>
    %16 = vector.shape_cast %15 : vector<8xf32> to vector<8x1xf32>
    %cst_6 = arith.constant dense<0.000000e+00> : vector<8xf32>
    %17 = vector.multi_reduction <add>, %5, %cst_6 [1] : vector<8x32xf32> to vector<8xf32>
    %18 = vector.shape_cast %17 : vector<8xf32> to vector<8x1xf32>
    %cst_7 = arith.constant 3.200000e+01 : f32
    %19 = vector.broadcast %cst_7 : f32 to vector<8x1xf32>
    %20 = arith.divf %18, %19 : vector<8x1xf32>
    %cst_8 = arith.constant 0.899999976 : f32
    %21 = vector.broadcast %cst_8 : f32 to vector<8x1xf32>
    %22 = arith.mulf %21, %16 : vector<8x1xf32>
    %23 = arith.subf %9, %22 : vector<8x1xf32>
    %cst_9 = arith.constant 1.000000e-01 : f32
    %24 = vector.broadcast %cst_9 : f32 to vector<8x1xf32>
    %25 = arith.mulf %24, %20 : vector<8x1xf32>
    %26 = arith.subf %23, %25 : vector<8x1xf32>
    %c8_i32 = arith.constant 8 : i32
    %27 = arith.muli %arg0, %c8_i32 : i32
    %28 = tpu.iota {dimensions = array<i32: 0>} : vector<8x1xi32>
    %29 = vector.broadcast %27 : i32 to vector<8x1xi32>
    %30 = arith.addi %29, %28 : vector<8x1xi32>
    %c8_i32_10 = arith.constant 8 : i32
    %31 = vector.broadcast %c8_i32_10 : i32 to vector<8x1xi32>
    %32 = arith.cmpi slt, %30, %31 : vector<8x1xi32>
    %cst_11 = arith.constant 0.000000e+00 : f32
    %33 = vector.broadcast %cst_11 : f32 to vector<8x1xf32>
    %34 = arith.select %32, %26, %33 : vector<8x1xi1>, vector<8x1xf32>
    %35 = vector.shape_cast %34 : vector<8x1xf32> to vector<1x8x1xf32>
    %cst_12 = arith.constant dense<0.000000e+00> : vector<1xf32>
    %36 = vector.multi_reduction <add>, %35, %cst_12 [1, 2] : vector<1x8x1xf32> to vector<1xf32>
    %37 = vector.shape_cast %36 : vector<1xf32> to vector<1x1x1xf32>
    %38 = vector.extract %37[0, 0, 0] : f32 from vector<1x1x1xf32>
    %39 = vector.broadcast %38 : f32 to vector<1x1xf32>
    %c0_13 = arith.constant 0 : index
    %c0_14 = arith.constant 0 : index
    %40 = vector.load %arg3[%c0_13, %c0_14] : memref<1x1xf32, #tpu.memory_space<vmem>>, vector<1x1xf32>
    tpu.vector_store %arg3[%c0_13, %c0_14], %39 {strides = array<i32>} : memref<1x1xf32, #tpu.memory_space<vmem>>, vector<1x1xf32>,
    return
  }
  func.func @transform_0(%arg0: i32) -> (i32, i32) {
    %c0_i32 = arith.constant 0 : i32
    %c0_i32_0 = arith.constant 0 : i32
    return %arg0, %c0_i32 : i32, i32
  }
  func.func @transform_1(%arg0: i32) -> (i32, i32) {
    %c0_i32 = arith.constant 0 : i32
    %c0_i32_0 = arith.constant 0 : i32
    return %arg0, %c0_i32 : i32, i32
  }
  func.func @transform_2(%arg0: i32) -> (i32, i32) {
    %c0_i32 = arith.constant 0 : i32
    %c0_i32_0 = arith.constant 0 : i32
    return %arg0, %c0_i32 : i32, i32
  }
}

</mosaic_0001>

<bundles_post_ra>
// kernel: tpu_custom_call.1
= control target key start
LH: loop header
LB: loop body
LE: loop exit
PB: predicated region body
PF: predicated region fallthrough
CT: control target
= control target key end

     0   :  { %vm14_vm0 = vcmask 261120   ;;  %s141_s0 = inlined_call_operand.vmem [shape: f32[8,32], index: 0, kind: input, shape index: {}]   ;;  %s142_s1 = inlined_call_operand.vmem [shape: s32[8,1], index: 1, kind: input, shape index: {}]   ;;  %s143_s2 = inlined_call_operand.hbm [shape: f32[1,1], index: 2, kind: output, shape index: {}]  }
   0x1   :  { %v12_v0 = vld [vmem:[%s141_s0] sm:$0xff] }
   0x2   :  { %7 = vsyncpa [#allocation3], 0  ;;  %v15_v1 = vsel %vm14_vm0, %v12_v0, -inf  ;;  %v111_v2 = vmov 0   ;;  %v13_v3 = vld [vmem:[%s142_s1] sm:$0xff]  ;;  %v26_v7 = vlaneseq  ;;  %vm52_vm2 = vcmask 7168  }
   0x3   :  { %84 = vset.pattern.permute.xlu0 %v111_v2  ;;  %s112_s0 = smov [#allocation2]   ;;  %vm64_vm3 = vcmask 0  }
   0x4   :  { %16 = vmax.xlane.f32.xlu0 %v15_v1  ;;  %v27_v8 = vand.u32 127, %v26_v7  ;;  %s72_s1 = sshll.u32 %s112_s0, 4  ;;  %s73_s1 = int_to_ptr.vmem [resolvable:$true] %s72_s1 }
   0x5   :  { %s89_s14 = scalar_lea.vmem %s73_s1, 16  ;;  %s93_s15 = scalar_lea.vmem %s73_s1, 32 }
   0x6   :  { %p90_p0 = scmp.ne.s32.totalorder %s73_s1, %s89_s14  ;;  %p94_p1 = scmp.lt.s32.totalorder %s73_s1, %s73_s1 }
   0x7   :  { %p95_p2 = scmp.lt.s32.totalorder %s93_s15, %s89_s14 }
   0x9   :  { %p96_p3 = por %p95_p2, %p94_p1 }
   0xb   :  { %p97_p4 = pnand %p96_p3, %p90_p0 }
  0x1a   :  { %29 = vperm.xlu0 %84, %v13_v3  }
  0x8d   :  { %v17_v4 = vpop.xlane.xlu0 %16 }
  0x8e   :  { %v18_v5 = vsub.f32 %v12_v0, %v17_v4 }
  0x90   :  { %v19_v6 = vmul.f32 1.442695, %v18_v5  ;;  %v36_v14 = vsel %vm14_vm0, %v18_v5, 0.0 }
  0x92   :  { %85 = vpow2.f32 %v19_v6 }
  0x95   :  { %v30_v9 = vpop.permute.xlu0 %29 }
  0x96   :  { %vm31_vm1 = vcmp.eq.s32.totalorder %v27_v8, %v30_v9 }
  0x97   :  { %v32_v12 = vsel %vm31_vm1, %v18_v5, 0.0 }
  0x98   :  { %v33_v13 = vsel %vm14_vm0, %v32_v12, 0.0 }
  0x9f   :  { %v86_v10 = vpop.eup %85 }
  0xa0   :  { %v21_v11 = vsel %vm14_vm0, %v86_v10, 0.0 }
  0xa1   :  { %22 = vadd.xlane.f32.xlu1 %v21_v11 }
  0xa5   :  { %34 = vadd.xlane.f32.xlu1 %v33_v13 }
  0xa9   :  { %37 = vadd.xlane.f32.xlu1 %v36_v14 }
 0x12a   :  { %v23_v15 = vpop.xlane.xlu1 %22 }
 0x12b   :  { %87 = vlog2.f32 %v23_v15 }
 0x12e   :  { %v35_v16 = vpop.xlane.xlu1 %34 }
 0x12f   :  { %v41_v21 = vmul.f32 0.9, %v35_v16 }
 0x132   :  { %v38_v17 = vpop.xlane.xlu1 %37 }
 0x133   :  { %v40_v18 = vmul.f32 0.03125, %v38_v17 }
 0x135   :  { %v43_v23 = vmul.f32 0.1, %v40_v18 }
 0x138   :  { %v88_v19 = vpop.eup %87 }
 0x139   :  { %v25_v20 = vmul.f32 0.6931472, %v88_v19 }
 0x13b   :  { %v42_v22 = vsub.f32 %v25_v20, %v41_v21 }
 0x13d   :  { %v44_v24 = vsub.f32 %v42_v22, %v43_v23 }
 0x13f   :  { %v53_v25 = vsel %vm52_vm2, %v44_v24, 0.0 }
 0x140   :  { %54 = vadd.xlane.f32.xlu1 %v53_v25 }
 0x1c9   :  { %v55_v26 = vpop.xlane.xlu1 %54 }
 0x1ca   :  { %v56_v27 = vrot.slane %v55_v26, 4 }
 0x1cc   :  { %v57_v28 = vadd.f32 %v56_v27, %v55_v26 }
 0x1ce   :  { %v58_v29 = vrot.slane %v57_v28, 2 }
 0x1d0   :  { %v59_v30 = vadd.f32 %v58_v29, %v57_v28 }
 0x1d2   :  { %v60_v31 = vrot.slane %v59_v30, 1 }
 0x1d4   :  { %v61_v32 = vadd.f32 %v60_v31, %v59_v30 }
 0x1d6   :  { %80 = vpush %v61_v32 }
 0x207   :  { %s81_s13 = spop %80 }
 0x208   :  { %v63_v33 = vstv %s81_s13 }
 0x209   :  { %65 = vst.msk [vmem:[#allocation2] sm:$0x1] %vm64_vm3, %v63_v33 }
 0x20a   :  { %100 = shalt.err (!%p97_p4)
}
 0x20b   :  { %75 = dma.vmem_to_hbm [thread:$0]  %s73_s1, 16, %s143_s2, [#allocation3]  }
 0x20c   :  { %109 = dma.done.wait [#allocation3], 16  }
 0x20d   :  { %110 = vsyncadd [#allocation3], 4294967280 }
 0x20e   :  { %79 = vsyncpa [#allocation3], 1 }

</bundles_post_ra>
